<compile_context>
chip_gen: v7x
topology: tpu7x:2x2x1
jax: 0.10.0
libtpu: 0.0.40
codegen_flags: <defaults>
</compile_context>

<pallas_src>
import jax
import jax.numpy as jnp
from jax.experimental import pallas as pl
from jax.experimental.pallas import tpu as pltpu


def _net_kernel(x_ref, w1_ref, b1_ref, w2_ref, b2_ref, o_ref):
    # ReLU(True) on the raw input, kept in f32 (v5e's VPU has no bf16 ALU
    # path; f32 elementwise avoids pack/unpack filler there, free on v6e/v7x).
    x = jnp.maximum(x_ref[...], 0.0)
    # Cast only the MXU operands to bf16 *in-kernel*: no standalone convert
    # HLO, no extra HBM pass over x.  f32 MXU accumulation.
    h = jnp.dot(
        x.astype(jnp.bfloat16),
        w1_ref[...].astype(jnp.bfloat16),
        preferred_element_type=jnp.float32,
    )
    # Bias add + ReLU in f32.
    h = jnp.maximum(h + b1_ref[...], 0.0)
    # Linear(10, action_num): tiny f32 dot, off the bandwidth critical path.
    o = jnp.dot(h, w2_ref[...], preferred_element_type=jnp.float32)
    o_ref[...] = (o + b2_ref[...]).astype(o_ref.dtype)


def _choose_tb(batch):
    """Pick a batch tile with no padding and no output slicing:
      * small or oddly sized batch -> one full-array block (a block equal to
        the full dim is always legal, regardless of the /8 rule),
      * otherwise the largest tile in {4096..256} that divides the batch and
        leaves >= 2 grid steps (v7x megacore sharding) while staying big
        enough to amortize the ~0.35us per-grid-step overhead.
    """
    if batch <= 256 or batch % 16 != 0:
        return batch
    for tb in (4096, 2048, 1024, 512, 256):
        if 2 * tb <= batch and batch % tb == 0:
            return tb
    return batch


def net_forward(x, w1, b1, w2, b2, *, tb=None):
    """x: [B, width*height] f32; w1: [width*height, 10]; b1: [1, 10];
    w2: [10, action_num]; b2: [1, action_num] -> [B, action_num] f32.

    Weights are stored transposed vs PyTorch ((in, out) instead of (out, in))
    so the kernel does plain row-major matmuls.
    """
    batch, in_features = x.shape
    hidden = w1.shape[1]
    action_num = w2.shape[1]

    if tb is None:
        tb = _choose_tb(batch)
    if batch % tb != 0:
        raise ValueError("tb must divide batch (padding-free path)")
    num_tiles = batch // tb

    flops = 2 * batch * (in_features * hidden + hidden * action_num)
    bytes_accessed = 4 * (
        x.size + w1.size + b1.size + w2.size + b2.size + batch * action_num
    )

    return pl.pallas_call(
        _net_kernel,
        out_shape=jax.ShapeDtypeStruct((batch, action_num), jnp.float32),
        grid_spec=pl.GridSpec(
            grid=(num_tiles,),
            in_specs=[
                # x: one batch tile per grid step (auto double-buffered DMA).
                pl.BlockSpec((tb, in_features), lambda i: (i, 0)),
                # Weights / biases: same block every step -> VMEM-resident.
                pl.BlockSpec((in_features, hidden), lambda i: (0, 0)),
                pl.BlockSpec((1, hidden), lambda i: (0, 0)),
                pl.BlockSpec((hidden, action_num), lambda i: (0, 0)),
                pl.BlockSpec((1, action_num), lambda i: (0, 0)),
            ],
            out_specs=pl.BlockSpec((tb, action_num), lambda i: (i, 0)),
        ),
        compiler_params=pltpu.CompilerParams(
            # Batch tiles are independent: shard across TensorCores on v7x
            # (measured no-op on single-TC v5e/v6e).
            dimension_semantics=("parallel",),
        ),
        cost_estimate=pl.CostEstimate(
            flops=flops, transcendentals=0, bytes_accessed=bytes_accessed
        ),
    )(x, w1, b1, w2, b2)


def init_params(key, in_features, hidden, action_num):
    """PyTorch-style uniform(-1/sqrt(fan_in), 1/sqrt(fan_in)) init (transposed)."""
    k1, k2, k3, k4 = jax.random.split(key, 4)
    bound1 = 1.0 / jnp.sqrt(in_features)
    bound2 = 1.0 / jnp.sqrt(hidden)
    w1 = jax.random.uniform(k1, (in_features, hidden), jnp.float32, -bound1, bound1)
    b1 = jax.random.uniform(k2, (1, hidden), jnp.float32, -bound1, bound1)
    w2 = jax.random.uniform(k3, (hidden, action_num), jnp.float32, -bound2, bound2)
    b2 = jax.random.uniform(k4, (1, action_num), jnp.float32, -bound2, bound2)
    return w1, b1, w2, b2


def net_reference_f32(x, w1, b1, w2, b2):
    x = jnp.maximum(x, 0.0)
    h = jnp.maximum(x @ w1 + b1, 0.0)
    return h @ w2 + b2


def net_reference_bf16(x, w1, b1, w2, b2):
    # Matched-precision reference (f32 ReLU, bf16 MXU operands, f32 accumulate).
    xb = jnp.maximum(x, 0.0).astype(jnp.bfloat16)
    h = jnp.dot(xb, w1.astype(jnp.bfloat16), preferred_element_type=jnp.float32)
    h = jnp.maximum(h + b1, 0.0)
    return jnp.dot(h, w2, preferred_element_type=jnp.float32) + b2


if __name__ == "__main__":
    # Shapes consistent with the module: width=8, height=4, action_num=4.
    width, height, action_num = 8, 4, 4
    hidden = 10
    in_features = width * height

    key = jax.random.PRNGKey(0)
    kx, kp = jax.random.split(key)
    w1, b1, w2, b2 = init_params(kp, in_features, hidden, action_num)

    # Case 1: multi-tile batch (512 -> two 256-row tiles; exercises the
    # pipelined, megacore-shardable batch grid).
    batch = 512
    x = jax.random.normal(kx, (batch, in_features), jnp.float32)
    out = jax.block_until_ready(net_forward(x, w1, b1, w2, b2))
    assert out.shape == (batch, action_num)
    ref_bf16 = net_reference_bf16(x, w1, b1, w2, b2)
    ref_f32 = net_reference_f32(x, w1, b1, w2, b2)
    assert jnp.allclose(out, ref_bf16, atol=1e-3, rtol=1e-3), "mismatch vs bf16-matched ref"
    assert jnp.allclose(out, ref_f32, atol=5e-2, rtol=5e-2), "mismatch vs f32 ref"

    # Case 2: tiny RL batch (batch=2): single full-array block, no padding,
    # no output slice.
    x_small = jax.random.normal(kx, (2, in_features), jnp.float32)
    out_small = jax.block_until_ready(net_forward(x_small, w1, b1, w2, b2))
    assert out_small.shape == (2, action_num)
    assert jnp.allclose(out_small, net_reference_bf16(x_small, w1, b1, w2, b2),
                        atol=1e-3, rtol=1e-3), "mismatch vs bf16-matched ref (small batch)"
    assert jnp.allclose(out_small, net_reference_f32(x_small, w1, b1, w2, b2),
                        atol=5e-2, rtol=5e-2), "mismatch vs f32 ref (small batch)"

    print("KERNEL_OK")
</pallas_src>

<mosaic_0001>
module attributes {stable_mosaic.version = 11 : i64} {
  func.func @_net_kernel(%arg0: i32, %arg1: memref<256x32xf32, #tpu.memory_space<vmem>>, %arg2: memref<32x10xf32, #tpu.memory_space<vmem>>, %arg3: memref<1x10xf32, #tpu.memory_space<vmem>>, %arg4: memref<10x4xf32, #tpu.memory_space<vmem>>, %arg5: memref<1x4xf32, #tpu.memory_space<vmem>>, %arg6: memref<256x4xf32, #tpu.memory_space<vmem>>) attributes {dimension_semantics = [#tpu.dimension_semantics<parallel>], iteration_bounds = array<i64: 2>, scalar_prefetch = 0 : i64, scratch_operands = 0 : i64, tpu.core_type = #tpu.core_type<tc>, window_params = [{transform_indices = @transform_0, window_bounds = array<i64: 256, 32>}, {pipeline_mode = #tpu.pipeline_mode<synchronous>, transform_indices = @transform_1, window_bounds = array<i64: 32, 10>}, {pipeline_mode = #tpu.pipeline_mode<synchronous>, transform_indices = @transform_2, window_bounds = array<i64: 1, 10>}, {pipeline_mode = #tpu.pipeline_mode<synchronous>, transform_indices = @transform_3, window_bounds = array<i64: 10, 4>}, {pipeline_mode = #tpu.pipeline_mode<synchronous>, transform_indices = @transform_4, window_bounds = array<i64: 1, 4>}, {transform_indices = @transform_5, window_bounds = array<i64: 256, 4>}]} {
    %c0 = arith.constant 0 : index
    %c0_0 = arith.constant 0 : index
    %0 = vector.load %arg1[%c0, %c0_0] : memref<256x32xf32, #tpu.memory_space<vmem>>, vector<256x32xf32>
    %cst = arith.constant 0.000000e+00 : f32
    %1 = vector.broadcast %cst : f32 to vector<256x32xf32>
    %2 = arith.maximumf %0, %1 : vector<256x32xf32>
    %3 = arith.truncf %2 : vector<256x32xf32> to vector<256x32xbf16>
    %c0_1 = arith.constant 0 : index
    %c0_2 = arith.constant 0 : index
    %4 = vector.load %arg2[%c0_1, %c0_2] : memref<32x10xf32, #tpu.memory_space<vmem>>, vector<32x10xf32>
    %5 = arith.truncf %4 : vector<32x10xf32> to vector<32x10xbf16>
    %cst_3 = arith.constant dense<0.000000e+00> : vector<256x10xf32>
    %6 = tpu.matmul %3, %5, %cst_3 {dimension_numbers = #tpu.dot_dimension_numbers<[1], [0], [0], [1], [0, 0, 1, 1], [], []>} : vector<256x32xbf16>, vector<32x10xbf16>, vector<256x10xf32> -> vector<256x10xf32>
    %c0_4 = arith.constant 0 : index
    %c0_5 = arith.constant 0 : index
    %7 = vector.load %arg3[%c0_4, %c0_5] : memref<1x10xf32, #tpu.memory_space<vmem>>, vector<1x10xf32>
    %8 = vector.broadcast %7 : vector<1x10xf32> to vector<256x10xf32>
    %9 = arith.addf %6, %8 : vector<256x10xf32>
    %cst_6 = arith.constant 0.000000e+00 : f32
    %10 = vector.broadcast %cst_6 : f32 to vector<256x10xf32>
    %11 = arith.maximumf %9, %10 : vector<256x10xf32>
    %c0_7 = arith.constant 0 : index
    %c0_8 = arith.constant 0 : index
    %12 = vector.load %arg4[%c0_7, %c0_8] : memref<10x4xf32, #tpu.memory_space<vmem>>, vector<10x4xf32>
    %cst_9 = arith.constant dense<0.000000e+00> : vector<256x4xf32>
    %13 = tpu.matmul %11, %12, %cst_9 {dimension_numbers = #tpu.dot_dimension_numbers<[1], [0], [0], [1], [0, 0, 1, 1], [], []>} : vector<256x10xf32>, vector<10x4xf32>, vector<256x4xf32> -> vector<256x4xf32>
    %c0_10 = arith.constant 0 : index
    %c0_11 = arith.constant 0 : index
    %14 = vector.load %arg5[%c0_10, %c0_11] : memref<1x4xf32, #tpu.memory_space<vmem>>, vector<1x4xf32>
    %15 = vector.broadcast %14 : vector<1x4xf32> to vector<256x4xf32>
    %16 = arith.addf %13, %15 : vector<256x4xf32>
    %c0_12 = arith.constant 0 : index
    %c0_13 = arith.constant 0 : index
    %17 = vector.load %arg6[%c0_12, %c0_13] : memref<256x4xf32, #tpu.memory_space<vmem>>, vector<256x4xf32>
    tpu.vector_store %arg6[%c0_12, %c0_13], %16 {strides = array<i32>} : memref<256x4xf32, #tpu.memory_space<vmem>>, vector<256x4xf32>,
    return
  }
  func.func @transform_0(%arg0: i32) -> (i32, i32) {
    %c0_i32 = arith.constant 0 : i32
    %c0_i32_0 = arith.constant 0 : i32
    return %arg0, %c0_i32 : i32, i32
  }
  func.func @transform_1(%arg0: i32) -> (i32, i32) {
    %c0_i32 = arith.constant 0 : i32
    %c0_i32_0 = arith.constant 0 : i32
    %c0_i32_1 = arith.constant 0 : i32
    return %c0_i32, %c0_i32_0 : i32, i32
  }
  func.func @transform_2(%arg0: i32) -> (i32, i32) {
    %c0_i32 = arith.constant 0 : i32
    %c0_i32_0 = arith.constant 0 : i32
    %c0_i32_1 = arith.constant 0 : i32
    return %c0_i32, %c0_i32_0 : i32, i32
  }
  func.func @transform_3(%arg0: i32) -> (i32, i32) {
    %c0_i32 = arith.constant 0 : i32
    %c0_i32_0 = arith.constant 0 : i32
    %c0_i32_1 = arith.constant 0 : i32
    return %c0_i32, %c0_i32_0 : i32, i32
  }
  func.func @transform_4(%arg0: i32) -> (i32, i32) {
    %c0_i32 = arith.constant 0 : i32
    %c0_i32_0 = arith.constant 0 : i32
    %c0_i32_1 = arith.constant 0 : i32
    return %c0_i32, %c0_i32_0 : i32, i32
  }
  func.func @transform_5(%arg0: i32) -> (i32, i32) {
    %c0_i32 = arith.constant 0 : i32
    %c0_i32_0 = arith.constant 0 : i32
    return %arg0, %c0_i32 : i32, i32
  }
}

</mosaic_0001>

<bundles_post_ra>
// kernel: tpu_custom_call.1
= control target key start
LH: loop header
LB: loop body
LE: loop exit
PB: predicated region body
PF: predicated region fallthrough
CT: control target
= control target key end

     0   :  { %s1244_s18 = smov 0   ;;  %s1508_s0 = inlined_call_operand.vmem [shape: f32[512,32], index: 0, kind: input, shape index: {}]   ;;  %s1509_s1 = inlined_call_operand.vmem [shape: f32[32,10], index: 1, kind: input, shape index: {}]   ;;  %s1510_s2 = inlined_call_operand.vmem [shape: f32[1,10], index: 2, kind: input, shape index: {}]   ;;  %s1511_s3 = inlined_call_operand.vmem [shape: f32[10,4], index: 3, kind: input, shape index: {}]   ;;  %s1512_s4 = inlined_call_operand.vmem [shape: f32[1,4], index: 4, kind: input, shape index: {}]   ;;  %s1513_s5 = inlined_call_operand.vmem [shape: f32[512,4], index: 5, kind: output, shape index: {}]  }
   0x1 LB: > { %s988_s19 = sadd.s32 4294967295, %s1211_s18   ;;  %p992_p0 = scmp.ge.s32.totalorder %s1211_s18, 1  ;;  %s1211_s18 = sphi %s1244_s18, %s15_s18  }
   0x2   : > { %p188_p1 = scmp.lt.s32.totalorder %s1211_s18, 3 }
   0x4   : > { %p189_p2 = pnand %p992_p0, %p188_p1 }
   0x5   : > { %v309_v0 = vld [vmem:[%s1509_s1] sm:$0xff] (!%p189_p2)  ;;  %v310_v1 = vld [vmem:[%s1509_s1 + $0x8] sm:$0xff] (!%p189_p2)  ;;  %v311_v2 = vld [vmem:[%s1509_s1 + $0x10] sm:$0xff] (!%p189_p2)  ;;  %s993_s26 = sshll.u32 (!%p189_p2), %s988_s19, 5  ;;  %vm322_vm0 = vcmask (!%p189_p2), 261120   ;;  %vm670_vm1 = vcmask (!%p189_p2), 1041408  }
   0x6   : > { %192 = sbr.rel (%p189_p2) target bundleno = 517 (0x205), region = 40  ;;  %v313_v3 = vpack.c.bf16 (!%p189_p2), %v310_v1, %v309_v0  ;;  %v312_v4 = vld [vmem:[%s1509_s1 + $0x18] sm:$0xff] (!%p189_p2)  ;;  %p217_p3 = scmp.lt.s32.totalorder (!%p189_p2), %s993_s26, 63  ;;  %vm1213_vm2 = vmmov (!%p189_p2), 1   ;;  %vm573_vm4 = vcmask (!%p189_p2), 80896   ;;  %vm899_vm5 = vcmask (!%p189_p2), 31744  }
   0x7   : > { %v314_v5 = vpack.c.bf16 (!%p189_p2), %v312_v4, %v311_v2  ;;  %vm1191_vm3 = vmpackc.low (!%p189_p2), %vm670_vm1, %vm1213_vm2 }
   0x8   : > { %1102 = vmatprep.subr.bf16.mxu0 (!%p189_p2), %v313_v3 }
   0x9   : > { %1103 = vmatpush3.bf16.msra.mxu0 (!%p189_p2), %v313_v3 }
   0xa   : > { %1104 = vmatprep.subr.bf16.mxu0 (!%p189_p2), %v314_v5 }
   0xd   : > { %s1515_s26 = smov (!%p217_p3, %s993_s26), 63  ;;  %1105 = vmatpush3.bf16.msra.mxu0 %v314_v5 }
   0xe   : > { %s994_s29 = sshll.u32 %s1515_s26, 3 }
   0xf   : > { %s1272_s7 = scalar_lea.vmem %s1508_s0, %s994_s29  ;;  %s1407_s19 = scalar_lea.vmem %s1513_s5, %s994_s29 }
  0x10   : > { %v229_v6 = vld [vmem:[%s1272_s7] sm:$0xff]  ;;  %v230_v7 = vld [vmem:[%s1272_s7 + $0x8] sm:$0xff]  ;;  %v231_v8 = vld [vmem:[%s1272_s7 + $0x10] sm:$0xff] }
  0x11   : > { %v261_v9 = vmax.f32 %v229_v6, 0.0  ;;  %v262_v10 = vmax.f32 %v230_v7, 0.0  ;;  %v232_v11 = vld [vmem:[%s1272_s7 + $0x18] sm:$0xff]  ;;  %v263_v12 = vmax.f32 %v231_v8, 0.0  ;;  %v233_v13 = vld [vmem:[%s1272_s7 + $0x20] sm:$0xff]  ;;  %v234_v14 = vld [vmem:[%s1272_s7 + $0x28] sm:$0xff] }
  0x12   : > { %v264_v15 = vmax.f32 %v232_v11, 0.0  ;;  %v265_v16 = vmax.f32 %v233_v13, 0.0  ;;  %v266_v17 = vmax.f32 %v234_v14, 0.0  ;;  %v235_v19 = vld [vmem:[%s1272_s7 + $0x30] sm:$0xff]  ;;  %v236_v20 = vld [vmem:[%s1272_s7 + $0x38] sm:$0xff]  ;;  %v237_v23 = vld [vmem:[%s1272_s7 + $0x40] sm:$0xff] }
  0x13   : > { %v293_v18 = vpack.c.bf16 %v262_v10, %v261_v9  ;;  %v238_v24 = vld [vmem:[%s1272_s7 + $0x48] sm:$0xff]  ;;  %v267_v25 = vmax.f32 %v235_v19, 0.0  ;;  %v268_v26 = vmax.f32 %v236_v20, 0.0  ;;  %v269_v27 = vmax.f32 %v237_v23, 0.0  ;;  %v239_v31 = vld [vmem:[%s1272_s7 + $0x50] sm:$0xff]  ;;  %v240_v32 = vld [vmem:[%s1272_s7 + $0x58] sm:$0xff] }
  0x14   : > { %v294_v21 = vpack.c.bf16 %v264_v15, %v263_v12  ;;  %v295_v22 = vpack.c.bf16 %v266_v17, %v265_v16  ;;  %v270_v28 = vmax.f32 %v238_v24, 0.0  ;;  %v241_v33 = vld [vmem:[%s1272_s7 + $0x60] sm:$0xff]  ;;  %v242_v34 = vld [vmem:[%s1272_s7 + $0x68] sm:$0xff]  ;;  %v271_v35 = vmax.f32 %v239_v31, 0.0  ;;  %v243_v41 = vld [vmem:[%s1272_s7 + $0x70] sm:$0xff] }
  0x15   : > { %1106 = vmatprep.mubr.msk.bf16.mxu0 %vm322_vm0, %v293_v18  ;;  %v296_v29 = vpack.c.bf16 %v268_v26, %v267_v25  ;;  %v272_v36 = vmax.f32 %v240_v32, 0.0  ;;  %v273_v37 = vmax.f32 %v241_v33, 0.0  ;;  %v274_v38 = vmax.f32 %v242_v34, 0.0  ;;  %v244_v42 = vld [vmem:[%s1272_s7 + $0x78] sm:$0xff]  ;;  %v245_v43 = vld [vmem:[%s1272_s7 + $0x80] sm:$0xff]  ;;  %v246_v44 = vld [vmem:[%s1272_s7 + $0x88] sm:$0xff] }
  0x16   : > { %1107 = vmatmul.mubr.msk.bf16.vlgmr.msra.gmra.mrb[0].mxu0 %vm322_vm0, %v294_v21  ;;  %v297_v30 = vpack.c.bf16 %v270_v28, %v269_v27  ;;  %v275_v45 = vmax.f32 %v243_v41, 0.0  ;;  %v276_v46 = vmax.f32 %v244_v42, 0.0  ;;  %v277_v47 = vmax.f32 %v245_v43, 0.0  ;;  %v247_v51 = vld [vmem:[%s1272_s7 + $0x90] sm:$0xff]  ;;  %v248_v52 = vld [vmem:[%s1272_s7 + $0x98] sm:$0xff]  ;;  %v249_v53 = vld [vmem:[%s1272_s7 + $0xa0] sm:$0xff] }
  0x17   : > { %1110 = vmatprep.mubr.msk.bf16.mxu0 %vm322_vm0, %v295_v22  ;;  %v298_v39 = vpack.c.bf16 %v272_v36, %v271_v35  ;;  %v299_v40 = vpack.c.bf16 %v274_v38, %v273_v37  ;;  %v278_v48 = vmax.f32 %v246_v44, 0.0  ;;  %v250_v54 = vld [vmem:[%s1272_s7 + $0xa8] sm:$0xff]  ;;  %v279_v55 = vmax.f32 %v247_v51, 0.0  ;;  %v251_v61 = vld [vmem:[%s1272_s7 + $0xb0] sm:$0xff]  ;;  %v252_v62 = vld [vmem:[%s1272_s7 + $0xb8] sm:$0xff] }
  0x18   : > { %v300_v49 = vpack.c.bf16 %v276_v46, %v275_v45  ;;  %v280_v56 = vmax.f32 %v248_v52, 0.0  ;;  %v281_v57 = vmax.f32 %v249_v53, 0.0  ;;  %v282_v58 = vmax.f32 %v250_v54, 0.0  ;;  %v253_v63 = vld [vmem:[%s1272_s7 + $0xc0] sm:$0xff]  ;;  %v254_v0 = vld [vmem:[%s1272_s7 + $0xc8] sm:$0xff]  ;;  %v255_v7 = vld [vmem:[%s1272_s7 + $0xd0] sm:$0xff] }
  0x19   : > { %v301_v50 = vpack.c.bf16 %v278_v48, %v277_v47  ;;  %v283_v1 = vmax.f32 %v251_v61, 0.0  ;;  %v284_v2 = vmax.f32 %v252_v62, 0.0  ;;  %v285_v3 = vmax.f32 %v253_v63, 0.0  ;;  %v256_v8 = vld [vmem:[%s1272_s7 + $0xd8] sm:$0xff]  ;;  %v257_v9 = vld [vmem:[%s1272_s7 + $0xe0] sm:$0xff]  ;;  %v258_v10 = vld [vmem:[%s1272_s7 + $0xe8] sm:$0xff] }
  0x1a   : > { %v302_v59 = vpack.c.bf16 %v280_v56, %v279_v55  ;;  %v303_v60 = vpack.c.bf16 %v282_v58, %v281_v57  ;;  %v286_v4 = vmax.f32 %v254_v0, 0.0  ;;  %v287_v11 = vmax.f32 %v255_v7, 0.0  ;;  %v259_v17 = vld [vmem:[%s1272_s7 + $0xf0] sm:$0xff]  ;;  %v260_v18 = vld [vmem:[%s1272_s7 + $0xf8] sm:$0xff]  ;;  %v564_v22 = vld [vmem:[%s1511_s3] sm:$0xff] }
  0x1b   : > { %v304_v5 = vpack.c.bf16 %v284_v2, %v283_v1  ;;  %v288_v12 = vmax.f32 %v256_v8, 0.0  ;;  %v289_v13 = vmax.f32 %v257_v9, 0.0  ;;  %v290_v14 = vmax.f32 %v258_v10, 0.0  ;;  %v565_v23 = vld [vmem:[%s1511_s3 + $0x8] sm:$0x3] }
  0x1c   : > { %v305_v6 = vpack.c.bf16 %v286_v4, %v285_v3  ;;  %v291_v19 = vmax.f32 %v259_v17, 0.0  ;;  %v292_v20 = vmax.f32 %v260_v18, 0.0  ;;  %v1190_v24 = vpack.c.bf16 %v565_v23, %v564_v22  ;;  %v1331_v25 = vld [vmem:[%s1510_s2] ss:$0 sm:$0xff] }
  0x1d   : > { %v306_v15 = vpack.c.bf16 %v288_v12, %v287_v11  ;;  %v307_v16 = vpack.c.bf16 %v290_v14, %v289_v13 }
  0x1e   : > { %1111 = vmatmul.mubr.msk.bf16.gmra.mrb[4].mxu0 %vm322_vm0, %v296_v29  ;;  %v308_v21 = vpack.c.bf16 %v292_v20, %v291_v19  ;;  %1192 = vmatprep.subr.msk.bf16.mxu1 %vm1191_vm3, %v1190_v24 }
  0x1f   : > { %1114 = vmatprep.mubr.msk.bf16.mxu0 %vm322_vm0, %v297_v30  ;;  %1195 = vmatpush3.bf16.msk.msra.mxu1 %vm1191_vm3, %v1190_v24 }
  0x26   : > { %1115 = vmatmul.mubr.msk.bf16.gmra.mrb[8].mxu0 %vm322_vm0, %v298_v39 }
  0x27   : > { %1118 = vmatprep.mubr.msk.bf16.mxu0 %vm322_vm0, %v299_v40 }
  0x2e   : > { %1119 = vmatmul.mubr.msk.bf16.gmra.mrb[12].mxu0 %vm322_vm0, %v300_v49 }
  0x2f   : > { %1122 = vmatprep.mubr.msk.bf16.mxu0 %vm322_vm0, %v301_v50 }
  0x36   : > { %1123 = vmatmul.mubr.msk.bf16.gmra.mrb[16].mxu0 %vm322_vm0, %v302_v59 }
  0x37   : > { %1126 = vmatprep.mubr.msk.bf16.mxu0 %vm322_vm0, %v303_v60 }
  0x3e   : > { %1127 = vmatmul.mubr.msk.bf16.gmra.mrb[20].mxu0 %vm322_vm0, %v304_v5 }
  0x3f   : > { %1130 = vmatprep.mubr.msk.bf16.mxu0 %vm322_vm0, %v305_v6 }
  0x46   : > { %1131 = vmatmul.mubr.msk.bf16.gmra.mrb[24].mxu0 %vm322_vm0, %v306_v15 }
  0x47   : > { %1134 = vmatprep.mubr.msk.bf16.mxu0 %vm322_vm0, %v307_v16 }
  0x4e   : > { %1135 = vmatmul.mubr.msk.bf16.gmra.mrb[28].mxu0 %vm322_vm0, %v308_v21 }
  0xe9   : > { %v1108_v26 = vpop.f32.mrb[0].mxu0 }
  0xea   : > { %v405_v27 = vpop.f32.mrb[1].mxu0  ;;  %v414_v30 = vadd.f32 %v1108_v26, %v1331_v25 }
  0xeb   : > { %v406_v28 = vadd.f32 %v1331_v25, %v405_v27  ;;  %v1109_v29 = vpop.f32.mrb[2].mxu0 }
  0xec   : > { %v408_v31 = vpop.f32.mrb[3].mxu0  ;;  %v417_v34 = vadd.f32 %v1109_v29, %v1331_v25  ;;  %v534_v36 = vmax.f32 %v414_v30, 0.0 }
  0xed   : > { %v532_v32 = vmax.f32 %v406_v28, 0.0  ;;  %v409_v33 = vadd.f32 %v1331_v25, %v408_v31 }
  0xee   : > { %v535_v39 = vmax.f32 %v417_v34, 0.0 }
  0xef   : > { %v533_v35 = vmax.f32 %v409_v33, 0.0  ;;  %1142 = vmatprep.mubr.msk.f32.mxu1 %vm573_vm4, %v532_v32 }
  0xf1   : > { %v1112_v37 = vpop.f32.mrb[4].mxu0  ;;  %1143 = vmatmul.mubr.msk.f32.vlgmr.msra.gmra.mrb[0].mxu1 %vm573_vm4, %v533_v35 }
  0xf2   : > { %v421_v38 = vpop.f32.mrb[5].mxu0  ;;  %1145 = vmatprep.mubr.msk.f32.mxu1 %vm573_vm4, %v534_v36  ;;  %v430_v42 = vadd.f32 %v1112_v37, %v1331_v25 }
  0xf3   : > { %v422_v40 = vadd.f32 %v1331_v25, %v421_v38  ;;  %v1113_v41 = vpop.f32.mrb[6].mxu0 }
  0xf4   : > { %v424_v43 = vpop.f32.mrb[7].mxu0  ;;  %v433_v46 = vadd.f32 %v1113_v41, %v1331_v25  ;;  %v538_v48 = vmax.f32 %v430_v42, 0.0 }
  0xf5   : > { %v536_v44 = vmax.f32 %v422_v40, 0.0  ;;  %v425_v45 = vadd.f32 %v1331_v25, %v424_v43  ;;  %1146 = vmatmul.mubr.msk.f32.gmra.mrb[2].mxu1 %vm573_vm4, %v535_v39 }
  0xf6   : > { %v539_v51 = vmax.f32 %v433_v46, 0.0 }
  0xf7   : > { %v537_v47 = vmax.f32 %v425_v45, 0.0  ;;  %1148 = vmatprep.mubr.msk.f32.mxu1 %vm573_vm4, %v536_v44 }
  0xf9   : > { %v1116_v49 = vpop.f32.mrb[8].mxu0  ;;  %1149 = vmatmul.mubr.msk.f32.gmra.mrb[4].mxu1 %vm573_vm4, %v537_v47 }
  0xfa   : > { %v437_v50 = vpop.f32.mrb[9].mxu0  ;;  %1151 = vmatprep.mubr.msk.f32.mxu1 %vm573_vm4, %v538_v48  ;;  %v446_v54 = vadd.f32 %v1116_v49, %v1331_v25 }
  0xfb   : > { %v438_v52 = vadd.f32 %v1331_v25, %v437_v50  ;;  %v1117_v53 = vpop.f32.mrb[10].mxu0 }
  0xfc   : > { %v440_v55 = vpop.f32.mrb[11].mxu0  ;;  %v449_v58 = vadd.f32 %v1117_v53, %v1331_v25  ;;  %v542_v60 = vmax.f32 %v446_v54, 0.0 }
  0xfd   : > { %v540_v56 = vmax.f32 %v438_v52, 0.0  ;;  %v441_v57 = vadd.f32 %v1331_v25, %v440_v55  ;;  %1152 = vmatmul.mubr.msk.f32.gmra.mrb[6].mxu1 %vm573_vm4, %v539_v51 }
  0xfe   : > { %v543_v63 = vmax.f32 %v449_v58, 0.0 }
  0xff   : > { %v541_v59 = vmax.f32 %v441_v57, 0.0  ;;  %1154 = vmatprep.mubr.msk.f32.mxu1 %vm573_vm4, %v540_v56 }
 0x101   : > { %v1120_v61 = vpop.f32.mrb[12].mxu0  ;;  %1155 = vmatmul.mubr.msk.f32.gmra.mrb[8].mxu1 %vm573_vm4, %v541_v59  ;;  %v1400_v59 = vld [vmem:[%s1512_s4] ss:$0 sm:$0xff] }
 0x102   : > { %v453_v62 = vpop.f32.mrb[13].mxu0  ;;  %1157 = vmatprep.mubr.msk.f32.mxu1 %vm573_vm4, %v542_v60  ;;  %v462_v2 = vadd.f32 %v1120_v61, %v1331_v25 }
 0x103   : > { %v454_v0 = vadd.f32 %v1331_v25, %v453_v62  ;;  %v1121_v1 = vpop.f32.mrb[14].mxu0 }
 0x104   : > { %v456_v3 = vpop.f32.mrb[15].mxu0  ;;  %v465_v6 = vadd.f32 %v1121_v1, %v1331_v25  ;;  %v546_v8 = vmax.f32 %v462_v2, 0.0 }
 0x105   : > { %v544_v4 = vmax.f32 %v454_v0, 0.0  ;;  %v457_v5 = vadd.f32 %v1331_v25, %v456_v3  ;;  %1158 = vmatmul.mubr.msk.f32.gmra.mrb[10].mxu1 %vm573_vm4, %v543_v63 }
 0x106   : > { %v547_v11 = vmax.f32 %v465_v6, 0.0 }
 0x107   : > { %v545_v7 = vmax.f32 %v457_v5, 0.0  ;;  %1160 = vmatprep.mubr.msk.f32.mxu1 %vm573_vm4, %v544_v4 }
 0x109   : > { %v1124_v9 = vpop.f32.mrb[16].mxu0  ;;  %1161 = vmatmul.mubr.msk.f32.gmra.mrb[12].mxu1 %vm573_vm4, %v545_v7 }
 0x10a   : > { %v469_v10 = vpop.f32.mrb[17].mxu0  ;;  %1163 = vmatprep.mubr.msk.f32.mxu1 %vm573_vm4, %v546_v8  ;;  %v478_v14 = vadd.f32 %v1124_v9, %v1331_v25 }
 0x10b   : > { %v470_v12 = vadd.f32 %v1331_v25, %v469_v10  ;;  %v1125_v13 = vpop.f32.mrb[18].mxu0 }
 0x10c   : > { %v472_v15 = vpop.f32.mrb[19].mxu0  ;;  %v481_v18 = vadd.f32 %v1125_v13, %v1331_v25  ;;  %v550_v20 = vmax.f32 %v478_v14, 0.0 }
 0x10d   : > { %v548_v16 = vmax.f32 %v470_v12, 0.0  ;;  %v473_v17 = vadd.f32 %v1331_v25, %v472_v15  ;;  %1164 = vmatmul.mubr.msk.f32.gmra.mrb[14].mxu1 %vm573_vm4, %v547_v11 }
 0x10e   : > { %v551_v23 = vmax.f32 %v481_v18, 0.0 }
 0x10f   : > { %v549_v19 = vmax.f32 %v473_v17, 0.0  ;;  %1166 = vmatprep.mubr.msk.f32.mxu1 %vm573_vm4, %v548_v16 }
 0x111   : > { %v1128_v21 = vpop.f32.mrb[20].mxu0  ;;  %1167 = vmatmul.mubr.msk.f32.gmra.mrb[16].mxu1 %vm573_vm4, %v549_v19 }
 0x112   : > { %v485_v22 = vpop.f32.mrb[21].mxu0  ;;  %1169 = vmatprep.mubr.msk.f32.mxu1 %vm573_vm4, %v550_v20  ;;  %v494_v27 = vadd.f32 %v1128_v21, %v1331_v25 }
 0x113   : > { %v486_v24 = vadd.f32 %v1331_v25, %v485_v22  ;;  %v1129_v26 = vpop.f32.mrb[22].mxu0 }
 0x114   : > { %v488_v28 = vpop.f32.mrb[23].mxu0  ;;  %v497_v31 = vadd.f32 %v1129_v26, %v1331_v25  ;;  %v554_v33 = vmax.f32 %v494_v27, 0.0 }
 0x115   : > { %v552_v29 = vmax.f32 %v486_v24, 0.0  ;;  %v489_v30 = vadd.f32 %v1331_v25, %v488_v28  ;;  %1170 = vmatmul.mubr.msk.f32.gmra.mrb[18].mxu1 %vm573_vm4, %v551_v23 }
 0x116   : > { %v555_v36 = vmax.f32 %v497_v31, 0.0 }
 0x117   : > { %v553_v32 = vmax.f32 %v489_v30, 0.0  ;;  %1172 = vmatprep.mubr.msk.f32.mxu1 %vm573_vm4, %v552_v29 }
 0x119   : > { %v1132_v34 = vpop.f32.mrb[24].mxu0  ;;  %1173 = vmatmul.mubr.msk.f32.gmra.mrb[20].mxu1 %vm573_vm4, %v553_v32 }
 0x11a   : > { %v501_v35 = vpop.f32.mrb[25].mxu0  ;;  %1175 = vmatprep.mubr.msk.f32.mxu1 %vm573_vm4, %v554_v33  ;;  %v510_v39 = vadd.f32 %v1132_v34, %v1331_v25 }
 0x11b   : > { %v502_v37 = vadd.f32 %v1331_v25, %v501_v35  ;;  %v1133_v38 = vpop.f32.mrb[26].mxu0 }
 0x11c   : > { %v504_v40 = vpop.f32.mrb[27].mxu0  ;;  %v513_v43 = vadd.f32 %v1133_v38, %v1331_v25  ;;  %v558_v45 = vmax.f32 %v510_v39, 0.0 }
 0x11d   : > { %v556_v41 = vmax.f32 %v502_v37, 0.0  ;;  %v505_v42 = vadd.f32 %v1331_v25, %v504_v40  ;;  %1176 = vmatmul.mubr.msk.f32.gmra.mrb[22].mxu1 %vm573_vm4, %v555_v36 }
 0x11e   : > { %v559_v48 = vmax.f32 %v513_v43, 0.0 }
 0x11f   : > { %v557_v44 = vmax.f32 %v505_v42, 0.0  ;;  %1178 = vmatprep.mubr.msk.f32.mxu1 %vm573_vm4, %v556_v41 }
 0x121   : > { %v1136_v46 = vpop.f32.mrb[28].mxu0  ;;  %1179 = vmatmul.mubr.msk.f32.gmra.mrb[24].mxu1 %vm573_vm4, %v557_v44 }
 0x122   : > { %v517_v47 = vpop.f32.mrb[29].mxu0  ;;  %1181 = vmatprep.mubr.msk.f32.mxu1 %vm573_vm4, %v558_v45  ;;  %v526_v51 = vadd.f32 %v1136_v46, %v1331_v25 }
 0x123   : > { %v518_v49 = vadd.f32 %v1331_v25, %v517_v47  ;;  %v1137_v50 = vpop.f32.mrb[30].mxu0 }
 0x124   : > { %v520_v52 = vpop.f32.mrb[31].mxu0  ;;  %v529_v55 = vadd.f32 %v1137_v50, %v1331_v25  ;;  %v562_v57 = vmax.f32 %v526_v51, 0.0 }
 0x125   : > { %v560_v53 = vmax.f32 %v518_v49, 0.0  ;;  %v521_v54 = vadd.f32 %v1331_v25, %v520_v52  ;;  %1182 = vmatmul.mubr.msk.f32.gmra.mrb[26].mxu1 %vm573_vm4, %v559_v48 }
 0x126   : > { %v563_v58 = vmax.f32 %v529_v55, 0.0 }
 0x127   : > { %v561_v56 = vmax.f32 %v521_v54, 0.0  ;;  %1184 = vmatprep.mubr.msk.f32.mxu1 %vm573_vm4, %v560_v53 }
 0x129   : > { %1185 = vmatmul.mubr.msk.f32.gmra.mrb[28].mxu1 %vm573_vm4, %v561_v56 }
 0x12a   : > { %1187 = vmatprep.mubr.msk.f32.mxu1 %vm573_vm4, %v562_v57 }
 0x12d   : > { %1188 = vmatmul.mubr.msk.f32.gmra.mrb[30].mxu1 %vm573_vm4, %v563_v58 }
 0x1c4   : > { %v1144_v25 = vpop.f32.mrb[0].mxu1 }
 0x1c5   : > { %v746_v60 = vadd.f32 %v1144_v25, %v1400_v59  ;;  %v740_v61 = vpop.f32.mrb[1].mxu1 }
 0x1c6   : > { %v741_v62 = vadd.f32 %v1400_v59, %v740_v61 }
 0x1c7   : > { %901 = vst.msk [vmem:[%s1407_s19 + $0x8] sm:$0xff] %vm899_vm5, %v746_v60 }
 0x1c8   : > { %900 = vst.msk [vmem:[%s1407_s19] sm:$0xff] %vm899_vm5, %v741_v62  ;;  %v1147_v63 = vpop.f32.mrb[2].mxu1 }
 0x1c9   : > { %v756_v0 = vadd.f32 %v1147_v63, %v1400_v59  ;;  %v750_v1 = vpop.f32.mrb[3].mxu1 }
 0x1ca   : > { %v751_v2 = vadd.f32 %v1400_v59, %v750_v1 }
 0x1cb   : > { %903 = vst.msk [vmem:[%s1407_s19 + $0x18] sm:$0xff] %vm899_vm5, %v756_v0 }
 0x1cc   : > { %902 = vst.msk [vmem:[%s1407_s19 + $0x10] sm:$0xff] %vm899_vm5, %v751_v2  ;;  %v1150_v3 = vpop.f32.mrb[4].mxu1 }
 0x1cd   : > { %v766_v4 = vadd.f32 %v1150_v3, %v1400_v59  ;;  %v760_v5 = vpop.f32.mrb[5].mxu1 }
 0x1ce   : > { %v761_v6 = vadd.f32 %v1400_v59, %v760_v5 }
 0x1cf   : > { %905 = vst.msk [vmem:[%s1407_s19 + $0x28] sm:$0xff] %vm899_vm5, %v766_v4 }
 0x1d0   : > { %904 = vst.msk [vmem:[%s1407_s19 + $0x20] sm:$0xff] %vm899_vm5, %v761_v6  ;;  %v1153_v7 = vpop.f32.mrb[6].mxu1 }
 0x1d1   : > { %v776_v8 = vadd.f32 %v1153_v7, %v1400_v59  ;;  %v770_v9 = vpop.f32.mrb[7].mxu1 }
 0x1d2   : > { %v771_v10 = vadd.f32 %v1400_v59, %v770_v9 }
 0x1d3   : > { %907 = vst.msk [vmem:[%s1407_s19 + $0x38] sm:$0xff] %vm899_vm5, %v776_v8 }
 0x1d4   : > { %906 = vst.msk [vmem:[%s1407_s19 + $0x30] sm:$0xff] %vm899_vm5, %v771_v10  ;;  %v1156_v11 = vpop.f32.mrb[8].mxu1 }
 0x1d5   : > { %v786_v12 = vadd.f32 %v1156_v11, %v1400_v59  ;;  %v780_v13 = vpop.f32.mrb[9].mxu1 }
 0x1d6   : > { %v781_v14 = vadd.f32 %v1400_v59, %v780_v13 }
 0x1d7   : > { %909 = vst.msk [vmem:[%s1407_s19 + $0x48] sm:$0xff] %vm899_vm5, %v786_v12 }
 0x1d8   : > { %908 = vst.msk [vmem:[%s1407_s19 + $0x40] sm:$0xff] %vm899_vm5, %v781_v14  ;;  %v1159_v15 = vpop.f32.mrb[10].mxu1 }
 0x1d9   : > { %v796_v16 = vadd.f32 %v1159_v15, %v1400_v59  ;;  %v790_v17 = vpop.f32.mrb[11].mxu1 }
 0x1da   : > { %v791_v18 = vadd.f32 %v1400_v59, %v790_v17 }
 0x1db   : > { %911 = vst.msk [vmem:[%s1407_s19 + $0x58] sm:$0xff] %vm899_vm5, %v796_v16 }
 0x1dc   : > { %910 = vst.msk [vmem:[%s1407_s19 + $0x50] sm:$0xff] %vm899_vm5, %v791_v18  ;;  %v1162_v19 = vpop.f32.mrb[12].mxu1 }
 0x1dd   : > { %v806_v20 = vadd.f32 %v1162_v19, %v1400_v59  ;;  %v800_v21 = vpop.f32.mrb[13].mxu1 }
 0x1de   : > { %v801_v22 = vadd.f32 %v1400_v59, %v800_v21 }
 0x1df   : > { %913 = vst.msk [vmem:[%s1407_s19 + $0x68] sm:$0xff] %vm899_vm5, %v806_v20 }
 0x1e0   : > { %912 = vst.msk [vmem:[%s1407_s19 + $0x60] sm:$0xff] %vm899_vm5, %v801_v22  ;;  %v1165_v23 = vpop.f32.mrb[14].mxu1 }
 0x1e1   : > { %v816_v24 = vadd.f32 %v1165_v23, %v1400_v59  ;;  %v810_v26 = vpop.f32.mrb[15].mxu1 }
 0x1e2   : > { %v811_v27 = vadd.f32 %v1400_v59, %v810_v26 }
 0x1e3   : > { %915 = vst.msk [vmem:[%s1407_s19 + $0x78] sm:$0xff] %vm899_vm5, %v816_v24 }
 0x1e4   : > { %914 = vst.msk [vmem:[%s1407_s19 + $0x70] sm:$0xff] %vm899_vm5, %v811_v27  ;;  %v1168_v28 = vpop.f32.mrb[16].mxu1 }
 0x1e5   : > { %v826_v29 = vadd.f32 %v1168_v28, %v1400_v59  ;;  %v820_v30 = vpop.f32.mrb[17].mxu1 }
 0x1e6   : > { %v821_v31 = vadd.f32 %v1400_v59, %v820_v30 }
 0x1e7   : > { %917 = vst.msk [vmem:[%s1407_s19 + $0x88] sm:$0xff] %vm899_vm5, %v826_v29 }
 0x1e8   : > { %916 = vst.msk [vmem:[%s1407_s19 + $0x80] sm:$0xff] %vm899_vm5, %v821_v31  ;;  %v1171_v32 = vpop.f32.mrb[18].mxu1 }
 0x1e9   : > { %v836_v33 = vadd.f32 %v1171_v32, %v1400_v59  ;;  %v830_v34 = vpop.f32.mrb[19].mxu1 }
 0x1ea   : > { %v831_v35 = vadd.f32 %v1400_v59, %v830_v34 }
 0x1eb   : > { %919 = vst.msk [vmem:[%s1407_s19 + $0x98] sm:$0xff] %vm899_vm5, %v836_v33 }
 0x1ec   : > { %918 = vst.msk [vmem:[%s1407_s19 + $0x90] sm:$0xff] %vm899_vm5, %v831_v35  ;;  %v1174_v36 = vpop.f32.mrb[20].mxu1 }
 0x1ed   : > { %v846_v37 = vadd.f32 %v1174_v36, %v1400_v59  ;;  %v840_v38 = vpop.f32.mrb[21].mxu1 }
 0x1ee   : > { %v841_v39 = vadd.f32 %v1400_v59, %v840_v38 }
 0x1ef   : > { %921 = vst.msk [vmem:[%s1407_s19 + $0xa8] sm:$0xff] %vm899_vm5, %v846_v37 }
 0x1f0   : > { %920 = vst.msk [vmem:[%s1407_s19 + $0xa0] sm:$0xff] %vm899_vm5, %v841_v39  ;;  %v1177_v40 = vpop.f32.mrb[22].mxu1 }
 0x1f1   : > { %v856_v41 = vadd.f32 %v1177_v40, %v1400_v59  ;;  %v850_v42 = vpop.f32.mrb[23].mxu1 }
 0x1f2   : > { %v851_v43 = vadd.f32 %v1400_v59, %v850_v42 }
 0x1f3   : > { %923 = vst.msk [vmem:[%s1407_s19 + $0xb8] sm:$0xff] %vm899_vm5, %v856_v41 }
 0x1f4   : > { %922 = vst.msk [vmem:[%s1407_s19 + $0xb0] sm:$0xff] %vm899_vm5, %v851_v43  ;;  %v1180_v44 = vpop.f32.mrb[24].mxu1 }
 0x1f5   : > { %v866_v45 = vadd.f32 %v1180_v44, %v1400_v59  ;;  %v860_v46 = vpop.f32.mrb[25].mxu1 }
 0x1f6   : > { %v861_v47 = vadd.f32 %v1400_v59, %v860_v46 }
 0x1f7   : > { %925 = vst.msk [vmem:[%s1407_s19 + $0xc8] sm:$0xff] %vm899_vm5, %v866_v45 }
 0x1f8   : > { %924 = vst.msk [vmem:[%s1407_s19 + $0xc0] sm:$0xff] %vm899_vm5, %v861_v47  ;;  %v1183_v48 = vpop.f32.mrb[26].mxu1 }
 0x1f9   : > { %v876_v49 = vadd.f32 %v1183_v48, %v1400_v59  ;;  %v870_v50 = vpop.f32.mrb[27].mxu1 }
 0x1fa   : > { %v871_v51 = vadd.f32 %v1400_v59, %v870_v50 }
 0x1fb   : > { %927 = vst.msk [vmem:[%s1407_s19 + $0xd8] sm:$0xff] %vm899_vm5, %v876_v49 }
 0x1fc   : > { %926 = vst.msk [vmem:[%s1407_s19 + $0xd0] sm:$0xff] %vm899_vm5, %v871_v51  ;;  %v1186_v52 = vpop.f32.mrb[28].mxu1 }
 0x1fd   : > { %v886_v53 = vadd.f32 %v1186_v52, %v1400_v59  ;;  %v880_v54 = vpop.f32.mrb[29].mxu1 }
 0x1fe   : > { %v881_v55 = vadd.f32 %v1400_v59, %v880_v54 }
 0x1ff   : > { %929 = vst.msk [vmem:[%s1407_s19 + $0xe8] sm:$0xff] %vm899_vm5, %v886_v53 }
 0x200   : > { %928 = vst.msk [vmem:[%s1407_s19 + $0xe0] sm:$0xff] %vm899_vm5, %v881_v55  ;;  %v1189_v56 = vpop.f32.mrb[30].mxu1 }
 0x201   : > { %v896_v57 = vadd.f32 %v1189_v56, %v1400_v59  ;;  %v890_v58 = vpop.f32.mrb[31].mxu1 }
 0x202   : > { %v891_v25 = vadd.f32 %v1400_v59, %v890_v58 }
 0x203   : > { %931 = vst.msk [vmem:[%s1407_s19 + $0xf8] sm:$0xff] %vm899_vm5, %v896_v57 }
 0x204   : > { %930 = vst.msk [vmem:[%s1407_s19 + $0xf0] sm:$0xff] %vm899_vm5, %v891_v25 }
 0x205 PF: > { %s15_s18 = sadd.s32 1, %s1211_s18  }
 0x206   : > { %p12_p4 = scmp.ge.s32.totalorder %s15_s18, 4  }
 0x208   :  { %14 = sbr.rel (!%p12_p4) target bundleno = 1 (0x1), region = 70 }

</bundles_post_ra>
